<compile_context>
chip_gen: v7x
topology: tpu7x:2x2x1
jax: 0.10.0
libtpu: 0.0.40
codegen_flags: <defaults>
</compile_context>

<pallas_src>
import functools

import jax
import jax.numpy as jnp
from jax.experimental import pallas as pl
from jax.experimental.pallas import tpu as pltpu


def _round_up(x, m):
    return (x + m - 1) // m * m


def _vmem_capacity_bytes():
    """Physical per-core VMEM (128 MiB on v5e/v6e, 64 MiB on v7x)."""
    try:
        info = pltpu.get_tpu_info()
        cap = getattr(info, "vmem_capacity_bytes", None)
        if cap:
            return int(cap)
    except Exception:
        pass
    return 64 << 20  # conservative fallback (v7x)


def select_glu_tiles(T, H, F, *, act_dtype, weight_dtype, tm=None, tf=None):
    """Pick static (tm, tf) so double-buffered tiles fit this generation's VMEM."""
    act_is = jnp.dtype(act_dtype).itemsize
    w_is = jnp.dtype(weight_dtype).itemsize
    sublane = 16 if jnp.dtype(act_dtype) == jnp.bfloat16 else 8
    budget = _vmem_capacity_bytes() - (8 << 20)  # headroom for compiler scratch

    tm = 512 if tm is None else tm
    tm = max(sublane, min(tm, _round_up(T, sublane)))
    tm = _round_up(tm, sublane)
    if T >= 512:  # keep >= 2 token tiles so both v7x cores get work
        tm = min(tm, _round_up(pl.cdiv(T, 2), sublane))

    tf = 512 if tf is None else tf
    tf = _round_up(min(tf, _round_up(F, 128)), 128)

    def footprint(tm_, tf_):
        return (2 * tm_ * H * act_is          # x tiles (double buffered)
                + 2 * tm_ * H * act_is        # output tiles
                + 2 * H * 2 * tf_ * w_is      # fused [w1|v1] tiles
                + 2 * tf_ * H * w_is          # w2 tiles
                + tm_ * H * 4                 # f32 accumulator (worst case)
                + tm_ * 3 * tf_ * 4)          # f32 intermediates (hg, gated)

    while footprint(tm, tf) > budget and tf > 128:
        tf = max(128, _round_up(tf // 2, 128))
    while footprint(tm, tf) > budget and tm > sublane:
        tm = max(sublane, _round_up(tm // 2, sublane))
    return tm, tf


def prepare_glu_weights(w1, v1, w2, *, tf, weight_dtype=None):
    """One-time weight prep (do this at init, NOT per forward call).

    Pads F up to a multiple of tf (exact: gelu(0) * 0 == 0) and fuses w1/v1 so
    F-tile f holds [w1[:, f*tf:(f+1)*tf] | v1[:, f*tf:(f+1)*tf]] side by side,
    letting a single MXU pass over x produce both the gelu input and the gate.
    Optionally casts weights to a matmul dtype (e.g. bf16) to halve HBM traffic.
    """
    H, F = w1.shape
    wd = jnp.dtype(weight_dtype) if weight_dtype is not None else w1.dtype
    Fp = _round_up(F, tf)
    nf = Fp // tf
    if Fp != F:
        w1 = jnp.pad(w1, ((0, 0), (0, Fp - F)))
        v1 = jnp.pad(v1, ((0, 0), (0, Fp - F)))
        w2 = jnp.pad(w2, ((0, Fp - F), (0, 0)))
    w1v1 = jnp.concatenate(
        [w1.reshape(H, nf, tf), v1.reshape(H, nf, tf)], axis=2
    ).reshape(H, nf * 2 * tf).astype(wd)
    return w1v1, w2.astype(wd)


def _glu_step(x_ref, w1v1_ref, w2_ref, acc_ref, *, tf, mm_dtype):
    """One (token-tile, ffn-tile) reduction step, accumulating into acc_ref (f32)."""
    f = pl.program_id(1)

    @pl.when(f == 0)
    def _init():
        acc_ref[...] = jnp.zeros_like(acc_ref)

    x = x_ref[...]
    if x.dtype != mm_dtype:
        x = x.astype(mm_dtype)
    # One MXU pass produces both gelu-input and gate: (tm, 2*tf) f32.
    hg = jnp.dot(x, w1v1_ref[...], preferred_element_type=jnp.float32)
    h = hg[:, :tf]
    g = hg[:, tf:]
    # tanh-approximate GELU (== torch F.gelu(..., approximate='tanh')); EUP slot.
    gated = jax.nn.gelu(h, approximate=True) * g
    # Second matmul: accumulate over the F reduction axis in fp32.
    acc_ref[...] += jnp.dot(gated.astype(mm_dtype), w2_ref[...],
                            preferred_element_type=jnp.float32)


def _glu_kernel_f32_out(x_ref, w1v1_ref, w2_ref, o_ref, *, tf, mm_dtype):
    # f32 output: accumulate directly into the resident output tile (no scratch).
    _glu_step(x_ref, w1v1_ref, w2_ref, o_ref, tf=tf, mm_dtype=mm_dtype)


def _glu_kernel_acc(x_ref, w1v1_ref, w2_ref, o_ref, acc_ref, *, tf, mm_dtype):
    # Narrow output dtype: accumulate into f32 scratch, cast out on the last f.
    _glu_step(x_ref, w1v1_ref, w2_ref, acc_ref, tf=tf, mm_dtype=mm_dtype)

    @pl.when(pl.program_id(1) == pl.num_programs(1) - 1)
    def _finalize():
        o_ref[...] = acc_ref[...].astype(o_ref.dtype)


@functools.partial(jax.jit, static_argnames=("tm", "tf"))
def glu_forward_prepared(x, w1v1, w2p, *, tm, tf):
    """x: [T, H]; w1v1: [H, nf*2*tf] fused/padded; w2p: [Fp, H] -> [T, H]."""
    T, H = x.shape
    Fp = w2p.shape[0]
    nf = Fp // tf
    act_dtype = x.dtype
    mm_dtype = w1v1.dtype
    act_is = jnp.dtype(act_dtype).itemsize
    w_is = jnp.dtype(mm_dtype).itemsize

    Tp = _round_up(T, tm)
    if Tp != T:
        x = jnp.pad(x, ((0, Tp - T), (0, 0)))
    n_token_tiles = Tp // tm

    out_is_f32 = act_dtype == jnp.float32
    acc_bytes = 0 if out_is_f32 else tm * H * 4

    # VMEM budget, capped at this generation's physical VMEM minus headroom.
    vmem_est = (
        2 * (tm * H) * act_is              # x tiles (double buffered)
        + 2 * (tm * H) * act_is            # out tiles
        + 2 * (H * 2 * tf) * w_is          # fused gate-weight tiles
        + 2 * (tf * H) * w_is              # w2 tiles
        + acc_bytes                        # f32 accumulator scratch (if any)
        + tm * 3 * tf * 4                  # f32 intermediates (hg, gated)
    )
    cap = _vmem_capacity_bytes()
    vmem_limit = int(min(max(int(vmem_est * 1.25) + (4 << 20), 32 << 20),
                         cap - (4 << 20)))

    # Cost estimate counts weight RE-streaming (once per token tile), padded shapes.
    cost = pl.CostEstimate(
        flops=6 * Tp * H * Fp,
        transcendentals=Tp * Fp,
        bytes_accessed=n_token_tiles * 3 * H * Fp * w_is + 2 * Tp * H * act_is,
    )

    if out_is_f32:
        kernel = functools.partial(_glu_kernel_f32_out, tf=tf, mm_dtype=mm_dtype)
        scratch = []
    else:
        kernel = functools.partial(_glu_kernel_acc, tf=tf, mm_dtype=mm_dtype)
        scratch = [pltpu.VMEM((tm, H), jnp.float32)]

    out = pl.pallas_call(
        kernel,
        out_shape=jax.ShapeDtypeStruct((Tp, H), act_dtype),
        grid_spec=pltpu.PrefetchScalarGridSpec(
            num_scalar_prefetch=0,
            grid=(n_token_tiles, nf),      # tokens parallel, F reduction last
            in_specs=[
                pl.BlockSpec((tm, H), lambda i, f: (i, 0)),        # x tile
                pl.BlockSpec((H, 2 * tf), lambda i, f: (0, f)),    # [w1|v1] tile
                pl.BlockSpec((tf, H), lambda i, f: (f, 0)),        # w2 tile
            ],
            # Same block index across f -> output (accumulator) stays resident.
            out_specs=pl.BlockSpec((tm, H), lambda i, f: (i, 0)),
            scratch_shapes=scratch,
        ),
        compiler_params=pltpu.CompilerParams(
            dimension_semantics=("parallel", "arbitrary"),
            vmem_limit_bytes=vmem_limit,
        ),
        cost_estimate=cost,
    )(x, w1v1, w2p)

    return out[:T]


def glu_forward(x, w1, v1, w2, *, tm=None, tf=None, weight_dtype=None):
    """Convenience one-shot wrapper. For real use, hoist prepare_glu_weights()
    to weight-init time and call glu_forward_prepared() per step."""
    T, H = x.shape
    F = w1.shape[1]
    wd = weight_dtype if weight_dtype is not None else w1.dtype
    tm_s, tf_s = select_glu_tiles(T, H, F, act_dtype=x.dtype, weight_dtype=wd,
                                  tm=tm, tf=tf)
    w1v1, w2p = prepare_glu_weights(w1, v1, w2, tf=tf_s, weight_dtype=wd)
    return glu_forward_prepared(x, w1v1, w2p, tm=tm_s, tf=tf_s)


def _reference(x, w1, v1, w2):
    h = jax.nn.gelu(x @ w1, approximate=True) * (x @ v1)
    return h @ w2


if __name__ == "__main__":
    key = jax.random.PRNGKey(0)
    kx, k1, k2, k3 = jax.random.split(key, 4)

    # ---- Test 1: f32, multiple F blocks (tf=256 -> nf=2), hoisted weight prep.
    T, H, F = 16, 128, 512
    x = jax.random.normal(kx, (T, H), dtype=jnp.float32)
    w1 = jax.random.normal(k1, (H, F), dtype=jnp.float32) * 0.05
    v1 = jax.random.normal(k2, (H, F), dtype=jnp.float32) * 0.05
    w2 = jax.random.normal(k3, (F, H), dtype=jnp.float32) * 0.05

    tm, tf = select_glu_tiles(T, H, F, act_dtype=x.dtype, weight_dtype=w1.dtype, tf=256)
    w1v1, w2p = prepare_glu_weights(w1, v1, w2, tf=tf)   # init-time prep (hoisted)
    out = jax.block_until_ready(glu_forward_prepared(x, w1v1, w2p, tm=tm, tf=tf))
    ref = _reference(x, w1, v1, w2)
    assert out.shape == (T, H)
    assert jnp.allclose(out, ref, atol=1e-4, rtol=1e-4), "mismatch vs reference (test 1)"

    # ---- Test 2: ragged T and F (exercises padding + F-axis accumulation).
    T2, H2, F2 = 20, 128, 640
    kx2, k12, k22, k32 = jax.random.split(jax.random.PRNGKey(0), 4)
    x2 = jax.random.normal(kx2, (T2, H2), dtype=jnp.float32)
    w12 = jax.random.normal(k12, (H2, F2), dtype=jnp.float32) * 0.05
    v12 = jax.random.normal(k22, (H2, F2), dtype=jnp.float32) * 0.05
    w22 = jax.random.normal(k32, (F2, H2), dtype=jnp.float32) * 0.05

    out2 = jax.block_until_ready(glu_forward(x2, w12, v12, w22, tf=256))
    ref2 = _reference(x2, w12, v12, w22)
    assert out2.shape == (T2, H2)
    assert jnp.allclose(out2, ref2, atol=1e-4, rtol=1e-4), "mismatch vs reference (test 2)"

    # ---- Test 3: bf16 activations + bf16 weights (scratch-accumulator + bf16 MXU path).
    xb = x.astype(jnp.bfloat16)
    w1b, v1b, w2b = (w1.astype(jnp.bfloat16), v1.astype(jnp.bfloat16),
                     w2.astype(jnp.bfloat16))
    outb = jax.block_until_ready(glu_forward(xb, w1b, v1b, w2b, tf=256))
    refb = _reference(xb.astype(jnp.float32), w1b.astype(jnp.float32),
                      v1b.astype(jnp.float32), w2b.astype(jnp.float32))
    assert outb.shape == (T, H) and outb.dtype == jnp.bfloat16
    assert jnp.allclose(outb.astype(jnp.float32), refb, atol=3e-2, rtol=3e-2), \
        "mismatch vs reference (test 3, bf16)"

    print("KERNEL_OK")
</pallas_src>

<mosaic_0001>
module attributes {stable_mosaic.version = 11 : i64} {
  func.func @_glu_kernel_f32_out(%arg0: i32, %arg1: i32, %arg2: memref<16x128xf32, #tpu.memory_space<vmem>>, %arg3: memref<128x512xf32, #tpu.memory_space<vmem>>, %arg4: memref<256x128xf32, #tpu.memory_space<vmem>>, %arg5: memref<16x128xf32, #tpu.memory_space<vmem>>) attributes {dimension_semantics = [#tpu.dimension_semantics<parallel>, #tpu.dimension_semantics<arbitrary>], iteration_bounds = array<i64: 1, 2>, scalar_prefetch = 0 : i64, scratch_operands = 0 : i64, tpu.core_type = #tpu.core_type<tc>, window_params = [{transform_indices = @transform_0, window_bounds = array<i64: 16, 128>}, {transform_indices = @transform_1, window_bounds = array<i64: 128, 512>}, {transform_indices = @transform_2, window_bounds = array<i64: 256, 128>}, {transform_indices = @transform_3, window_bounds = array<i64: 16, 128>}]} {
    %c0_i32 = arith.constant 0 : i32
    %0 = arith.cmpi eq, %arg1, %c0_i32 : i32
    %1 = arith.extui %0 : i1 to i32
    %c0_i32_0 = arith.constant 0 : i32
    %2 = arith.cmpi ne, %1, %c0_i32_0 : i32
    scf.if %2 {
      %cst_15 = arith.constant 0.000000e+00 : f32
      %27 = vector.broadcast %cst_15 : f32 to vector<16x128xf32>
      %c0_16 = arith.constant 0 : index
      %c0_17 = arith.constant 0 : index
      %28 = vector.load %arg5[%c0_16, %c0_17] : memref<16x128xf32, #tpu.memory_space<vmem>>, vector<16x128xf32>
      tpu.vector_store %arg5[%c0_16, %c0_17], %27 {strides = array<i32>} : memref<16x128xf32, #tpu.memory_space<vmem>>, vector<16x128xf32>,
    } else {
    }
    %c0 = arith.constant 0 : index
    %c0_1 = arith.constant 0 : index
    %3 = vector.load %arg2[%c0, %c0_1] : memref<16x128xf32, #tpu.memory_space<vmem>>, vector<16x128xf32>
    %c0_2 = arith.constant 0 : index
    %c0_3 = arith.constant 0 : index
    %4 = vector.load %arg3[%c0_2, %c0_3] : memref<128x512xf32, #tpu.memory_space<vmem>>, vector<128x512xf32>
    %cst = arith.constant dense<0.000000e+00> : vector<16x512xf32>
    %5 = tpu.matmul %3, %4, %cst {dimension_numbers = #tpu.dot_dimension_numbers<[1], [0], [0], [1], [0, 0, 1, 1], [], []>} : vector<16x128xf32>, vector<128x512xf32>, vector<16x512xf32> -> vector<16x512xf32>
    %6 = vector.extract_strided_slice %5 {offsets = [0, 0], sizes = [16, 256], strides = [1, 1]} : vector<16x512xf32> to vector<16x256xf32>
    %7 = vector.extract_strided_slice %5 {offsets = [0, 256], sizes = [16, 256], strides = [1, 1]} : vector<16x512xf32> to vector<16x256xf32>
    %8 = arith.mulf %6, %6 : vector<16x256xf32>
    %9 = arith.mulf %6, %8 : vector<16x256xf32>
    %cst_4 = arith.constant 4.471500e-02 : f32
    %10 = vector.broadcast %cst_4 : f32 to vector<16x256xf32>
    %11 = arith.mulf %10, %9 : vector<16x256xf32>
    %12 = arith.addf %6, %11 : vector<16x256xf32>
    %cst_5 = arith.constant 0.797884583 : f32
    %13 = vector.broadcast %cst_5 : f32 to vector<16x256xf32>
    %14 = arith.mulf %13, %12 : vector<16x256xf32>
    %15 = math.tanh %14 : vector<16x256xf32>
    %cst_6 = arith.constant 1.000000e+00 : f32
    %16 = vector.broadcast %cst_6 : f32 to vector<16x256xf32>
    %17 = arith.addf %16, %15 : vector<16x256xf32>
    %cst_7 = arith.constant 5.000000e-01 : f32
    %18 = vector.broadcast %cst_7 : f32 to vector<16x256xf32>
    %19 = arith.mulf %18, %17 : vector<16x256xf32>
    %20 = arith.mulf %6, %19 : vector<16x256xf32>
    %21 = arith.mulf %20, %7 : vector<16x256xf32>
    %c0_8 = arith.constant 0 : index
    %c0_9 = arith.constant 0 : index
    %22 = vector.load %arg5[%c0_8, %c0_9] : memref<16x128xf32, #tpu.memory_space<vmem>>, vector<16x128xf32>
    %c0_10 = arith.constant 0 : index
    %c0_11 = arith.constant 0 : index
    %23 = vector.load %arg4[%c0_10, %c0_11] : memref<256x128xf32, #tpu.memory_space<vmem>>, vector<256x128xf32>
    %cst_12 = arith.constant dense<0.000000e+00> : vector<16x128xf32>
    %24 = tpu.matmul %21, %23, %cst_12 {dimension_numbers = #tpu.dot_dimension_numbers<[1], [0], [0], [1], [0, 0, 1, 1], [], []>} : vector<16x256xf32>, vector<256x128xf32>, vector<16x128xf32> -> vector<16x128xf32>
    %25 = arith.addf %22, %24 : vector<16x128xf32>
    %c0_13 = arith.constant 0 : index
    %c0_14 = arith.constant 0 : index
    %26 = vector.load %arg5[%c0_13, %c0_14] : memref<16x128xf32, #tpu.memory_space<vmem>>, vector<16x128xf32>
    tpu.vector_store %arg5[%c0_13, %c0_14], %25 {strides = array<i32>} : memref<16x128xf32, #tpu.memory_space<vmem>>, vector<16x128xf32>,
    return
  }
  func.func @transform_0(%arg0: i32, %arg1: i32) -> (i32, i32) {
    %c0_i32 = arith.constant 0 : i32
    %c0_i32_0 = arith.constant 0 : i32
    return %arg0, %c0_i32 : i32, i32
  }
  func.func @transform_1(%arg0: i32, %arg1: i32) -> (i32, i32) {
    %c0_i32 = arith.constant 0 : i32
    %c0_i32_0 = arith.constant 0 : i32
    return %c0_i32, %arg1 : i32, i32
  }
  func.func @transform_2(%arg0: i32, %arg1: i32) -> (i32, i32) {
    %c0_i32 = arith.constant 0 : i32
    %c0_i32_0 = arith.constant 0 : i32
    return %arg1, %c0_i32 : i32, i32
  }
  func.func @transform_3(%arg0: i32, %arg1: i32) -> (i32, i32) {
    %c0_i32 = arith.constant 0 : i32
    %c0_i32_0 = arith.constant 0 : i32
    return %arg0, %c0_i32 : i32, i32
  }
}

</mosaic_0001>

<bundles_post_ra>
// kernel: glu_forward_prepared.1
= control target key start
LH: loop header
LB: loop body
LE: loop exit
PB: predicated region body
PF: predicated region fallthrough
CT: control target
= control target key end

     0   :  { %8 = vsyncpa [#allocation3], 0  ;;  %s1551_s0 = inlined_call_operand.hbm [shape: f32[16,128], index: 0, kind: input, shape index: {}]   ;;  %s1552_s1 = inlined_call_operand.hbm [shape: f32[128,1024], index: 1, kind: input, shape index: {}]   ;;  %s1553_s2 = inlined_call_operand.hbm [shape: f32[512,128], index: 2, kind: input, shape index: {}]   ;;  %s1554_s3 = inlined_call_operand.hbm [shape: f32[16,128], index: 3, kind: output, shape index: {}]  }
   0x1   :  { %9 = vsyncpa [#allocation6], 0 }
   0x2   :  { %11 = vsyncpa [#allocation6 + $0x1], 0 }
   0x3   :  { %12 = vsyncpa [#allocation4], 0  ;;  %s1217_s12 = smov 0   ;;  %s1219_s13 = smov 0  }
   0x4   :  { %s1221_s14 = smov 0   ;;  %s1223_s15 = smov 0  }
   0x5   :  { %s1225_s16 = smov 0   ;;  %s1227_s17 = smov 0  }
   0x6 LB: > { %s27_s18 = sadd.s32 1, %s1178_s16  ;;  %s63_s19 = sadd.s32 1, %s1170_s14  ;;  %s1182_s17 = sphi %s1227_s17, %s18_s17   ;;  %s1178_s16 = sphi %s1225_s16, %s1576_s16   ;;  %s1174_s15 = sphi %s1223_s15, %s1575_s15   ;;  %s1170_s14 = sphi %s1221_s14, %s1574_s14   ;;  %s1166_s13 = sphi %s1219_s13, %s1573_s13   ;;  %s1162_s12 = sphi %s1217_s12, %s1572_s12  }
   0x7   : > { %p28_p0 = scmp.ge.s32.totalorder %s27_s18, 2  ;;  %p70_p1 = scmp.ne.s32.totalorder %s1170_s14, %s1166_s13 }
   0x8   : > { %p71_p2 = scmp.eq.s32.totalorder %s1182_s17, 0  ;;  %p939_p4 = scmp.lt.s32.totalorder %s1182_s17, 2 }
   0x9   : > { %s1578_s18 = smov (%p28_p0, %s27_s18), 0  ;;  %s168_s21 = sand.u32 1, %s1182_s17  }
   0xa   : > { %p72_p3 = por %p71_p2, %p70_p1  ;;  %s60_s20 = ssub.s32 %s1178_s16, %s1578_s18 }
   0xb   : > { %p61_p5 = scmp.eq.s32.totalorder %s60_s20, 0  ;;  %s170_s22 = sand.u32 1, %s1170_s14  }
   0xc   : > { %s763_s23 = sshll.u32 %s1178_s16, 9  ;;  %s748_s25 = sshll.u32 %s170_s22, 9 }
   0xd   : > { %s1261_s24 = scalar_select %p61_p5, %s1170_s14, %s63_s19  }
   0xe   : > { %s1268_s28 = scalar_lea.hbm %s1552_s1, %s763_s23  ;;  %p1270_p6 = pnand %p939_p4, %p72_p3 }
   0xf   : > { %s172_s30 = scalar_lea.vmem [#allocation5], %s748_s25  ;;  %s1276_s5 = scalar_lea.sflag [#allocation6], %s168_s21 }
  0x10   : > { %s1561_s29 = scalar_select %p1270_p6, 1, 0 }
  0x11   : > { %s179_s4 = sshll.u32 %s172_s30, 4  ;;  %s1010_s6 = scalar_lea.hbm %s1268_s28, 8192  ;;  %s1274_s4 = int_to_ptr.vmem [resolvable:$true] %s179_s4 }
  0x12   : > { %p1011_p7 = scmp.ne.s32.totalorder %s1268_s28, %s1010_s6  ;;  %p1556_p8 = pneg %p1270_p6 }
  0x13   : > { %s1015_s9 = scalar_lea.hbm %s1552_s1, 16384  ;;  %p1016_p11 = scmp.lt.u32.totalorder %s1268_s28, %s1552_s1 }
  0x14   : > { %p1013_p9 = pnand %p1556_p8, %p1011_p7  ;;  %p1017_p12 = scmp.lt.u32.totalorder %s1015_s9, %s1010_s6 }
  0x15   : > { %p1019_p0 = scmp.lt.u32.totalorder %s1010_s6, %s1268_s28 }
  0x16   : > { %p1014_p10 = pneg %p1013_p9  ;;  %p1018_p13 = por %p1017_p12, %p1016_p11 }
  0x18   : > { %p1020_p1 = por %p1019_p0, %p1018_p13 }
  0x1a   : > { %p1021_p2 = pnand %p1020_p1, %p1014_p10 }
  0x1c   : > { %1024 = shalt.err (!%p1021_p2)
}
  0x1d   : > { %s1025_s19 = scalar_lea.vmem %s1274_s4, 8192  ;;  %s1184_s20 = smov [#allocation5]  }
  0x1e   : > { %p1026_p3 = scmp.ne.s32.totalorder %s1274_s4, %s1025_s19  ;;  %s1030_s21 = sshll.u32 %s1184_s20, 4  ;;  %s1031_s21 = int_to_ptr.vmem [resolvable:$false] %s1030_s21 }
  0x1f   : > { %s1032_s23 = scalar_lea.vmem %s1031_s21, 16384  ;;  %p1033_p7 = scmp.lt.s32.totalorder %s1274_s4, %s1031_s21 }
  0x20   : > { %p1028_p4 = pnand %p1026_p3, %p1556_p8  ;;  %p1034_p9 = scmp.lt.s32.totalorder %s1032_s23, %s1025_s19 }
  0x22   : > { %p1029_p5 = pneg %p1028_p4  ;;  %p1035_p11 = por %p1034_p9, %p1033_p7 }
  0x24   : > { %p1036_p12 = pnand %p1035_p11, %p1029_p5 }
  0x26   : > { %1039 = shalt.err (!%p1036_p12)
}
  0x27   : > { %s1185_s25 = smov 1024   ;;  %s1186_s26 = smov 512  }
  0x28   : > { %s1187_s27 = smov 32   ;;  %s1305_s30 = sadd.s32 4294967295, %s1182_s17  }
  0x29   : > { %934 = dma.hbm_to_vmem [thread:$0]  (!%p1270_p6), %s1268_s28, 8192, %s1274_s4, %s1276_s5, %s1185_s25, %s1186_s26, %s1187_s27  }
  0x2a   : > { %p76_p10 = scmp.ne.s32.totalorder %s1166_s13, %s1162_s12  ;;  %p1555_p13 = scmp.eq.s32.totalorder %s1305_s30, 0 }
  0x2b   : > { %p745_p0 = scmp.ge.s32.totalorder %s1182_s17, 1  ;;  %p139_p1 = scmp.lt.s32.totalorder %s1182_s17, 3 }
  0x2c   : > { %p1314_p2 = por %p1555_p13, %p76_p10  ;;  %s1188_s28 = smov [#allocation2]  }
  0x2d   : > { %p1318_p3 = pnand %p745_p0, %p139_p1  ;;  %s154_s4 = sshll.u32 %s1188_s28, 4  ;;  %s1322_s4 = int_to_ptr.vmem [resolvable:$true] %s154_s4 }
  0x2e   : > { %s1562_s6 = scalar_select %p1314_p2, 1, 0 }
  0x2f   : > { %s1563_s7 = scalar_select %p1318_p3, 1, 0 }
  0x30   : > { %p927_p4 = pneg %p1318_p3  ;;  %s751_s12 = sshll.u32 %s170_s22, 8 }
  0x31   : > { %s764_s8 = sshll.u32 %s1178_s16, 12  ;;  %s193_s20 = scalar_lea.vmem [#allocation7], %s751_s12 }
  0x32   : > { %p1331_p5 = pnand %p927_p4, %p1555_p13  ;;  %s1338_s19 = scalar_lea.hbm %s1553_s2, %s764_s8 }
  0x33   : > { %s200_s21 = sshll.u32 %s193_s20, 4  ;;  %s1040_s22 = scalar_lea.hbm %s1551_s0, 256  ;;  %s1340_s21 = int_to_ptr.vmem [resolvable:$true] %s200_s21 }
  0x34   : > { %p1041_p7 = scmp.ne.s32.totalorder %s1551_s0, %s1040_s22  ;;  %p1042_p9 = pneg %p1331_p5 }
  0x35   : > { %p1047_p10 = scmp.lt.u32.totalorder %s1040_s22, %s1551_s0 }
  0x36   : > { %p1043_p11 = pnand %p1042_p9, %p1041_p7 }
  0x38   : > { %p1044_p12 = pneg %p1043_p11 }
  0x3a   : > { %p1049_p0 = pnand %p1047_p10, %p1044_p12 }
  0x3c   : > { %1052 = shalt.err (!%p1049_p0)
}
  0x3d   : > { %s1053_s12 = scalar_lea.vmem %s1322_s4, 256  ;;  %p1061_p8 = scmp.lt.s32.totalorder %s1322_s4, %s1322_s4 }
  0x3e   : > { %p1054_p1 = scmp.ne.s32.totalorder %s1322_s4, %s1053_s12  ;;  %p1062_p2 = scmp.lt.s32.totalorder %s1053_s12, %s1053_s12 }
  0x40   : > { %p1056_p4 = pnand %p1054_p1, %p1042_p9  ;;  %p1063_p3 = por %p1062_p2, %p1061_p8 }
  0x42   : > { %p1057_p13 = pneg %p1056_p4 }
  0x44   : > { %p1064_p6 = pnand %p1063_p3, %p1057_p13 }
  0x46   : > { %1067 = shalt.err (!%p1064_p6)
}
  0x47   : > { %s1189_s8 = smov 128   ;;  %s1190_s11 = smov 8  }
  0x48   : > { %930 = dma.hbm_to_vmem [thread:$0]  (!%p1331_p5), %s1551_s0, 256, %s1322_s4, [#allocation3], %s1189_s8, %s1189_s8, %s1190_s11  }
  0x49   : > { %s1068_s25 = scalar_lea.hbm %s1338_s19, 4096  ;;  %p1565_p6 = scmp.ne.s32.totalorder %s1561_s29, 0 }
  0x4a   : > { %p1069_p8 = scmp.ne.s32.totalorder %s1338_s19, %s1068_s25  ;;  %s1073_s27 = scalar_lea.hbm %s1553_s2, 8192 }
  0x4b   : > { %p1566_p13 = pneg %p1565_p6  ;;  %p1074_p7 = scmp.lt.u32.totalorder %s1338_s19, %s1553_s2 }
  0x4c   : > { %p1075_p9 = scmp.lt.u32.totalorder %s1073_s27, %s1068_s25  ;;  %p1077_p12 = scmp.lt.u32.totalorder %s1068_s25, %s1338_s19 }
  0x4d   : > { %p1071_p2 = pnand %p1069_p8, %p1566_p13 }
  0x4e   : > { %p1076_p11 = por %p1075_p9, %p1074_p7 }
  0x4f   : > { %p1072_p3 = pneg %p1071_p2 }
  0x50   : > { %p1078_p10 = por %p1077_p12, %p1076_p11 }
  0x52   : > { %p1079_p0 = pnand %p1078_p10, %p1072_p3 }
  0x54   : > { %1082 = shalt.err (!%p1079_p0)
}
  0x55   : > { %s1083_s4 = scalar_lea.vmem %s1340_s21, 4096  ;;  %p1567_p1 = pmov %p1566_p13 }
  0x56   : > { %p1084_p5 = scmp.ne.s32.totalorder %s1340_s21, %s1083_s4  ;;  %s1191_s9 = smov [#allocation7]  }
  0x57   : > { %s1088_s12 = sshll.u32 %s1191_s9, 4  ;;  %s1089_s12 = int_to_ptr.vmem [resolvable:$false] %s1088_s12 }
  0x58   : > { %p1086_p4 = pnand %p1084_p5, %p1567_p1  ;;  %s1090_s20 = scalar_lea.vmem %s1089_s12, 8192 }
  0x59   : > { %p1091_p13 = scmp.lt.s32.totalorder %s1340_s21, %s1089_s12  ;;  %p1092_p2 = scmp.lt.s32.totalorder %s1090_s20, %s1083_s4 }
  0x5a   : > { %p1087_p8 = pneg %p1086_p4 }
  0x5b   : > { %p1093_p7 = por %p1092_p2, %p1091_p13 }
  0x5d   : > { %p1094_p9 = pnand %p1093_p7, %p1087_p8 }
  0x5f   : > { %1097 = shalt.err (!%p1094_p9)
}
  0x60   : > { %937 = dma.hbm_to_vmem [thread:$0]  (!%p1565_p6), %s1338_s19, 4096, %s1340_s21, %s1276_s5, %s1189_s8, %s1189_s8, %s1190_s11  }
  0x61   : > { %p1568_p3 = scmp.ne.s32.totalorder %s1563_s7, 0 }
  0x62   : > { %p1569_p11 = scmp.eq.s32.totalorder (!%p1568_p3), %s1305_s30, 0 }
  0x63   : > { %212 = sbr.rel (%p1568_p3) target bundleno = 637 (0x27d), region = 32 }
  0x6a   : > { %1149 = dma.done.wait (%p1569_p11), [#allocation3], 256   ;;  %p1570_p12 = pmov %p1569_p11 }
  0x6b   : > { %s218_s29 = sand.u32 1, %s1305_s30   ;;  %s220_s23 = sand.u32 1, %s1166_s13  }
  0x6c   : > { %1151 = vsyncadd (%p1570_p12), [#allocation3], 4294967040  ;;  %s756_s25 = sshll.u32 %s220_s23, 9  ;;  %s219_s22 = scalar_lea.sflag [#allocation6], %s218_s29 }
  0x6d   : > { %s1401_s26 = scalar_lea.vmem [#allocation5], %s756_s25  ;;  %p1571_p10 = scmp.ne.s32.totalorder %s1562_s6, 0 }
  0x6f   : > { %1153 = dma.done.wait (%p1571_p10), %s219_s22, 12288  }
  0x70   : > { %1155 = vsyncadd (%p1571_p10), %s219_s22, 4294955008  ;;  %s757_s5 = sshll.u32 %s220_s23, 8  ;;  %p758_p6 = scmp.ne.s32.totalorder %s1174_s15, 0 }
  0x71   : > { %s1407_s7 = scalar_lea.vmem [#allocation7], %s757_s5  ;;  %v1192_v0 = vmov (!%p758_p6), 0.0  }
  0x72   : > { %261 = sbr.rel (%p758_p6) target bundleno = 121 (0x79), region = 48  ;;  %262 = vst [vmem:[#allocation8] sm:$0xff] (!%p758_p6), %v1192_v0  ;;  %263 = vst [vmem:[#allocation8 + $0x8] sm:$0xff] (!%p758_p6), %v1192_v0 }
  0x79 PF: > { %v267_v1 = vld [vmem:[%s1401_s26 + $0x8] sm:$0xff]  ;;  %v266_v3 = vld [vmem:[%s1401_s26] sm:$0xff]  ;;  %v1193_v8 = vmov 0.0   ;;  %v269_v26 = vld [vmem:[%s1401_s26 + $0x18] sm:$0xff]  ;;  %s1194_s15 = smov [#allocation8]   ;;  %p941_p0 = scmp.eq.s32.totalorder %s1305_s30, 1 }
  0x7a   : > { %v271_v2 = vld [vmem:[%s1401_s26 + $0x28] sm:$0xff]  ;;  %v270_v5 = vld [vmem:[%s1401_s26 + $0x20] sm:$0xff]  ;;  %394 = vmatprep.mubr.f32.mxu0 %v1193_v8  ;;  %471 = vmatprep.mubr.f32.mxu1 %v1193_v8  ;;  %v273_v27 = vld [vmem:[%s1401_s26 + $0x38] sm:$0xff]  ;;  %s646_s6 = sshll.u32 %s1194_s15, 4  ;;  %s647_s6 = int_to_ptr.vmem [resolvable:$true] %s646_s6 }
  0x7b   : > { %v803_v4 = vpack.c.bf16 %v271_v2, %v267_v1  ;;  %v275_v6 = vld [vmem:[%s1401_s26 + $0x48] sm:$0xff]  ;;  %v805_v9 = vpack.c.bf16 %v270_v5, %v266_v3  ;;  %v274_v11 = vld [vmem:[%s1401_s26 + $0x40] sm:$0xff]  ;;  %v835_v29 = vpack.c.bf16 %v273_v27, %v269_v26  ;;  %v268_v30 = vld [vmem:[%s1401_s26 + $0x10] sm:$0xff]  ;;  %s1098_s19 = scalar_lea.vmem %s647_s6, 256  ;;  %p1105_p8 = scmp.lt.s32.totalorder %s647_s6, %s647_s6 }
  0x7c   : > { %v279_v7 = vld [vmem:[%s1401_s26 + $0x68] sm:$0xff]  ;;  %v278_v12 = vld [vmem:[%s1401_s26 + $0x60] sm:$0xff]  ;;  %v272_v31 = vld [vmem:[%s1401_s26 + $0x30] sm:$0xff]  ;;  %p1099_p5 = scmp.ne.s32.totalorder %s647_s6, %s1098_s19  ;;  %p1106_p13 = scmp.lt.s32.totalorder %s1098_s19, %s1098_s19 }
  0x7d   : > { %v807_v10 = vpack.c.bf16 %v279_v7, %v275_v6  ;;  %v283_v13 = vld [vmem:[%s1401_s26 + $0x88] sm:$0xff]  ;;  %804 = vmatprep.subr.bf16.mxu0 %v803_v4  ;;  %v809_v15 = vpack.c.bf16 %v278_v12, %v274_v11  ;;  %v282_v17 = vld [vmem:[%s1401_s26 + $0x80] sm:$0xff]  ;;  %v837_v34 = vpack.c.bf16 %v272_v31, %v268_v30  ;;  %836 = vmatprep.subr.bf16.mxu1 %v835_v29  ;;  %v277_v37 = vld [vmem:[%s1401_s26 + $0x58] sm:$0xff] }
  0x7e   : > { %v287_v14 = vld [vmem:[%s1401_s26 + $0xa8] sm:$0xff]  ;;  %806 = vmatpush1.bf16.msra.mxu0 %v805_v9  ;;  %v286_v18 = vld [vmem:[%s1401_s26 + $0xa0] sm:$0xff]  ;;  %v281_v38 = vld [vmem:[%s1401_s26 + $0x78] sm:$0xff]  ;;  %p1100_p1 = pnand %p1099_p5, %p941_p0  ;;  %p1107_p2 = por %p1106_p13, %p1105_p8 }
  0x7f   : > { %808 = vmatprep.subr.bf16.mxu0 %v807_v10  ;;  %v811_v16 = vpack.c.bf16 %v287_v14, %v283_v13  ;;  %v291_v19 = vld [vmem:[%s1401_s26 + $0xc8] sm:$0xff]  ;;  %v813_v21 = vpack.c.bf16 %v286_v18, %v282_v17  ;;  %v290_v22 = vld [vmem:[%s1401_s26 + $0xc0] sm:$0xff]  ;;  %v276_v39 = vld [vmem:[%s1401_s26 + $0x50] sm:$0xff]  ;;  %838 = vmatpush1.bf16.msra.mxu1 %v837_v34  ;;  %v839_v42 = vpack.c.bf16 %v281_v38, %v277_v37 }
  0x80   : > { %v295_v20 = vld [vmem:[%s1401_s26 + $0xe8] sm:$0xff]  ;;  %v294_v23 = vld [vmem:[%s1401_s26 + $0xe0] sm:$0xff]  ;;  %v280_v43 = vld [vmem:[%s1401_s26 + $0x70] sm:$0xff]  ;;  %p1101_p4 = pneg %p1100_p1 }
  0x81   : > { %v815_v24 = vpack.c.bf16 %v295_v20, %v291_v19  ;;  %v299_v25 = vld [vmem:[%s1401_s26 + $0x108] sm:$0xff]  ;;  %v298_v32 = vld [vmem:[%s1401_s26 + $0x100] sm:$0xff]  ;;  %v817_v35 = vpack.c.bf16 %v294_v23, %v290_v22  ;;  %v285_v44 = vld [vmem:[%s1401_s26 + $0x98] sm:$0xff]  ;;  %v841_v45 = vpack.c.bf16 %v280_v43, %v276_v39  ;;  %840 = vmatprep.subr.bf16.mxu1 %v839_v42 }
  0x82   : > { %810 = vmatpush1.bf16.msra.mxu0 %v809_v15  ;;  %v303_v28 = vld [vmem:[%s1401_s26 + $0x128] sm:$0xff]  ;;  %v302_v33 = vld [vmem:[%s1401_s26 + $0x120] sm:$0xff]  ;;  %v289_v46 = vld [vmem:[%s1401_s26 + $0xb8] sm:$0xff]  ;;  %p1108_p7 = pnand %p1107_p2, %p1101_p4 }
  0x83   : > { %812 = vmatprep.subr.bf16.mxu0 %v811_v16  ;;  %v307_v36 = vld [vmem:[%s1401_s26 + $0x148] sm:$0xff]  ;;  %v819_v40 = vpack.c.bf16 %v303_v28, %v299_v25  ;;  %v284_v47 = vld [vmem:[%s1401_s26 + $0x90] sm:$0xff]  ;;  %v843_v49 = vpack.c.bf16 %v289_v46, %v285_v44  ;;  %v293_v50 = vld [vmem:[%s1401_s26 + $0xd8] sm:$0xff]  ;;  %v821_v52 = vpack.c.bf16 %v302_v33, %v298_v32  ;;  %842 = vmatpush1.bf16.msra.mxu1 %v841_v45 }
  0x84   : > { %v311_v41 = vld [vmem:[%s1401_s26 + $0x168] sm:$0xff]  ;;  %v288_v48 = vld [vmem:[%s1401_s26 + $0xb0] sm:$0xff]  ;;  %v297_v51 = vld [vmem:[%s1401_s26 + $0xf8] sm:$0xff] }
  0x85   : > { %v823_v53 = vpack.c.bf16 %v311_v41, %v307_v36  ;;  %v306_v54 = vld [vmem:[%s1401_s26 + $0x140] sm:$0xff]  ;;  %v315_v56 = vld [vmem:[%s1401_s26 + $0x188] sm:$0xff]  ;;  %v845_v57 = vpack.c.bf16 %v288_v48, %v284_v47  ;;  %844 = vmatprep.subr.bf16.mxu1 %v843_v49  ;;  %v847_v59 = vpack.c.bf16 %v297_v51, %v293_v50  ;;  %v292_v60 = vld [vmem:[%s1401_s26 + $0xd0] sm:$0xff] }
  0x86   : > { %814 = vmatpush1.bf16.msra.mxu0 %v813_v21  ;;  %v310_v55 = vld [vmem:[%s1401_s26 + $0x160] sm:$0xff]  ;;  %v319_v58 = vld [vmem:[%s1401_s26 + $0x1a8] sm:$0xff]  ;;  %v296_v61 = vld [vmem:[%s1401_s26 + $0xf0] sm:$0xff] }
  0x87   : > { %816 = vmatprep.subr.bf16.mxu0 %v815_v24  ;;  %v301_v62 = vld [vmem:[%s1401_s26 + $0x118] sm:$0xff]  ;;  %v825_v0 = vpack.c.bf16 %v310_v55, %v306_v54  ;;  %v827_v1 = vpack.c.bf16 %v319_v58, %v315_v56  ;;  %v314_v2 = vld [vmem:[%s1401_s26 + $0x180] sm:$0xff]  ;;  %v323_v4 = vld [vmem:[%s1401_s26 + $0x1c8] sm:$0xff]  ;;  %846 = vmatpush1.bf16.msra.mxu1 %v845_v57  ;;  %v849_v5 = vpack.c.bf16 %v296_v61, %v292_v60 }
  0x88   : > { %v305_v63 = vld [vmem:[%s1401_s26 + $0x138] sm:$0xff]  ;;  %v318_v3 = vld [vmem:[%s1401_s26 + $0x1a0] sm:$0xff]  ;;  %v327_v6 = vld [vmem:[%s1401_s26 + $0x1e8] sm:$0xff]  ;;  %848 = vmatprep.subr.bf16.mxu1 %v847_v59 }
  0x89   : > { %v851_v7 = vpack.c.bf16 %v305_v63, %v301_v62  ;;  %v300_v9 = vld [vmem:[%s1401_s26 + $0x110] sm:$0xff]  ;;  %v309_v11 = vld [vmem:[%s1401_s26 + $0x158] sm:$0xff]  ;;  %v829_v13 = vpack.c.bf16 %v318_v3, %v314_v2  ;;  %v831_v14 = vpack.c.bf16 %v327_v6, %v323_v4  ;;  %v322_v15 = vld [vmem:[%s1401_s26 + $0x1c0] sm:$0xff] }
  0x8a   : > { %818 = vmatpush1.bf16.msra.mxu0 %v817_v35  ;;  %v304_v10 = vld [vmem:[%s1401_s26 + $0x130] sm:$0xff]  ;;  %v313_v12 = vld [vmem:[%s1401_s26 + $0x178] sm:$0xff]  ;;  %v326_v16 = vld [vmem:[%s1401_s26 + $0x1e0] sm:$0xff] }
  0x8b   : > { %820 = vmatprep.subr.bf16.mxu0 %v819_v40  ;;  %850 = vmatpush1.bf16.msra.mxu1 %v849_v5  ;;  %v853_v17 = vpack.c.bf16 %v304_v10, %v300_v9  ;;  %v855_v18 = vpack.c.bf16 %v313_v12, %v309_v11  ;;  %v308_v19 = vld [vmem:[%s1401_s26 + $0x150] sm:$0xff]  ;;  %v317_v21 = vld [vmem:[%s1401_s26 + $0x198] sm:$0xff]  ;;  %v833_v23 = vpack.c.bf16 %v326_v16, %v322_v15  ;;  %v542_v37 = vld [vmem:[%s1407_s7 + $0x80] sm:$0xff] }
  0x8c   : > { %852 = vmatprep.subr.bf16.mxu1 %v851_v7  ;;  %v312_v20 = vld [vmem:[%s1401_s26 + $0x170] sm:$0xff]  ;;  %v321_v22 = vld [vmem:[%s1401_s26 + $0x1b8] sm:$0xff]  ;;  %v543_v38 = vld [vmem:[%s1407_s7 + $0x88] sm:$0xff] }
  0x8d   : > { %v857_v24 = vpack.c.bf16 %v312_v20, %v308_v19  ;;  %v859_v25 = vpack.c.bf16 %v321_v22, %v317_v21  ;;  %v316_v26 = vld [vmem:[%s1401_s26 + $0x190] sm:$0xff]  ;;  %v325_v28 = vld [vmem:[%s1401_s26 + $0x1d8] sm:$0xff]  ;;  %v867_v39 = vpack.c.bf16 %v543_v38, %v542_v37  ;;  %v526_v40 = vld [vmem:[%s1407_s7] sm:$0xff] }
  0x8e   : > { %822 = vmatpush1.bf16.msra.mxu0 %v821_v52  ;;  %v320_v27 = vld [vmem:[%s1401_s26 + $0x1b0] sm:$0xff]  ;;  %v329_v29 = vld [vmem:[%s1401_s26 + $0x1f8] sm:$0xff]  ;;  %v527_v41 = vld [vmem:[%s1407_s7 + $0x8] sm:$0xff] }
  0x8f   : > { %824 = vmatprep.subr.bf16.mxu0 %v823_v53  ;;  %854 = vmatpush1.bf16.msra.mxu1 %v853_v17  ;;  %v264_v30 = vld [vmem:[#allocation2] sm:$0xff]  ;;  %v861_v31 = vpack.c.bf16 %v320_v27, %v316_v26  ;;  %v863_v32 = vpack.c.bf16 %v329_v29, %v325_v28  ;;  %v265_v35 = vld [vmem:[#allocation2 + $0x8] sm:$0xff]  ;;  %v869_v42 = vpack.c.bf16 %v527_v41, %v526_v40  ;;  %v546_v48 = vld [vmem:[%s1407_s7 + $0xa0] sm:$0xff] }
  0x90   : > { %856 = vmatprep.subr.bf16.mxu1 %v855_v18  ;;  %v324_v33 = vld [vmem:[%s1401_s26 + $0x1d0] sm:$0xff]  ;;  %v545_v44 = vld [vmem:[%s1407_s7 + $0x98] sm:$0xff]  ;;  %v547_v49 = vld [vmem:[%s1407_s7 + $0xa8] sm:$0xff] }
  0x91   : > { %v328_v34 = vld [vmem:[%s1401_s26 + $0x1f0] sm:$0xff]  ;;  %v529_v46 = vld [vmem:[%s1407_s7 + $0x18] sm:$0xff]  ;;  %v875_v50 = vpack.c.bf16 %v547_v49, %v546_v48  ;;  %v530_v51 = vld [vmem:[%s1407_s7 + $0x20] sm:$0xff] }
  0x92   : > { %826 = vmatpush1.bf16.msra.mxu0 %v825_v0  ;;  %v865_v36 = vpack.c.bf16 %v328_v34, %v324_v33  ;;  %v544_v43 = vld [vmem:[%s1407_s7 + $0x90] sm:$0xff]  ;;  %v531_v52 = vld [vmem:[%s1407_s7 + $0x28] sm:$0xff]  ;;  %v549_v55 = vld [vmem:[%s1407_s7 + $0xb8] sm:$0xff] }
  0x93   : > { %828 = vmatprep.subr.bf16.mxu0 %v827_v1  ;;  %858 = vmatpush1.bf16.msra.mxu1 %v857_v24  ;;  %v871_v45 = vpack.c.bf16 %v545_v44, %v544_v43  ;;  %v877_v53 = vpack.c.bf16 %v531_v52, %v530_v51  ;;  %v548_v54 = vld [vmem:[%s1407_s7 + $0xb0] sm:$0xff]  ;;  %v533_v58 = vld [vmem:[%s1407_s7 + $0x38] sm:$0xff]  ;;  %v550_v60 = vld [vmem:[%s1407_s7 + $0xc0] sm:$0xff] }
  0x94   : > { %860 = vmatprep.subr.bf16.mxu1 %v859_v25  ;;  %v879_v56 = vpack.c.bf16 %v549_v55, %v548_v54  ;;  %v532_v57 = vld [vmem:[%s1407_s7 + $0x30] sm:$0xff]  ;;  %v551_v61 = vld [vmem:[%s1407_s7 + $0xc8] sm:$0xff]  ;;  %v534_v63 = vld [vmem:[%s1407_s7 + $0x40] sm:$0xff] }
  0x95   : > { %v881_v59 = vpack.c.bf16 %v533_v58, %v532_v57  ;;  %v883_v62 = vpack.c.bf16 %v551_v61, %v550_v60  ;;  %v535_v0 = vld [vmem:[%s1407_s7 + $0x48] sm:$0xff]  ;;  %v552_v2 = vld [vmem:[%s1407_s7 + $0xd0] sm:$0xff]  ;;  %v553_v3 = vld [vmem:[%s1407_s7 + $0xd8] sm:$0xff] }
  0x96   : > { %830 = vmatpush1.bf16.msra.mxu0 %v829_v13  ;;  %v885_v1 = vpack.c.bf16 %v535_v0, %v534_v63  ;;  %v536_v4 = vld [vmem:[%s1407_s7 + $0x50] sm:$0xff]  ;;  %v887_v5 = vpack.c.bf16 %v553_v3, %v552_v2  ;;  %v537_v6 = vld [vmem:[%s1407_s7 + $0x58] sm:$0xff]  ;;  %v554_v7 = vld [vmem:[%s1407_s7 + $0xe0] sm:$0xff] }
  0x97   : > { %832 = vmatprep.subr.bf16.mxu0 %v831_v14  ;;  %862 = vmatpush1.bf16.msra.mxu1 %v861_v31  ;;  %v555_v9 = vld [vmem:[%s1407_s7 + $0xe8] sm:$0xff]  ;;  %v889_v10 = vpack.c.bf16 %v537_v6, %v536_v4  ;;  %v538_v12 = vld [vmem:[%s1407_s7 + $0x60] sm:$0xff]  ;;  %v556_v15 = vld [vmem:[%s1407_s7 + $0xf0] sm:$0xff] }
  0x98   : > { %864 = vmatprep.subr.bf16.mxu1 %v863_v32  ;;  %v891_v11 = vpack.c.bf16 %v555_v9, %v554_v7  ;;  %v539_v13 = vld [vmem:[%s1407_s7 + $0x68] sm:$0xff]  ;;  %v557_v16 = vld [vmem:[%s1407_s7 + $0xf8] sm:$0xff]  ;;  %v540_v18 = vld [vmem:[%s1407_s7 + $0x70] sm:$0xff] }
  0x99   : > { %v893_v14 = vpack.c.bf16 %v539_v13, %v538_v12  ;;  %v895_v17 = vpack.c.bf16 %v557_v16, %v556_v15  ;;  %v541_v19 = vld [vmem:[%s1407_s7 + $0x78] sm:$0xff] }
  0x9a   : > { %834 = vmatpush1.bf16.msra.mxu0 %v833_v23  ;;  %v897_v20 = vpack.c.bf16 %v541_v19, %v540_v18 }
  0x9b   : > { %866 = vmatpush1.bf16.msra.mxu1 %v865_v36  ;;  %868 = vmatprep.subr.bf16.mxu0 %v867_v39 }
  0x9c   : > { %899 = vmatprep.subr.bf16.mxu1 %v867_v39 }
  0x9d   : > { %395 = vmatmul.mubr.f32.vlgmr.msra.gmra.mrb[0].mxu0 %v264_v30 }
  0x9e   : > { %400 = vmatprep.mubr.f32.mxu0 %v1193_v8  ;;  %472 = vmatmul.mubr.f32.vlgmr.msra.gmra.mrb[0].mxu1 %v264_v30 }
  0x9f   : > { %477 = vmatprep.mubr.f32.mxu1 %v1193_v8  ;;  %870 = vmatpush3.bf16.msra.mxu0 %v869_v42  ;;  %v528_v8 = vld [vmem:[%s1407_s7 + $0x10] sm:$0xff] }
  0xa0   : > { %907 = vmatpush3.bf16.msra.mxu1 %v869_v42  ;;  %v873_v47 = vpack.c.bf16 %v529_v46, %v528_v8  ;;  %872 = vmatprep.subr.bf16.mxu0 %v871_v45 }
  0xa1   : > { %401 = vmatmul.mubr.f32.gmra.mrb[2].mxu0 %v265_v35  ;;  %900 = vmatprep.subr.bf16.mxu1 %v871_v45 }
  0xa2   : > { %478 = vmatmul.mubr.f32.gmra.mrb[2].mxu1 %v265_v35 }
  0xa3   : > { %874 = vmatpush3.bf16.msra.mxu0 %v873_v47 }
  0xa4   : > { %908 = vmatpush3.bf16.msra.mxu1 %v873_v47  ;;  %876 = vmatprep.subr.bf16.mxu0 %v875_v50 }
  0xa5   : > { %901 = vmatprep.subr.bf16.mxu1 %v875_v50 }
  0xa7   : > { %878 = vmatpush3.bf16.msra.mxu0 %v877_v53 }
  0xa8   : > { %909 = vmatpush3.bf16.msra.mxu1 %v877_v53  ;;  %880 = vmatprep.subr.bf16.mxu0 %v879_v56 }
  0xa9   : > { %902 = vmatprep.subr.bf16.mxu1 %v879_v56 }
  0xab   : > { %882 = vmatpush3.bf16.msra.mxu0 %v881_v59 }
  0xac   : > { %910 = vmatpush3.bf16.msra.mxu1 %v881_v59  ;;  %884 = vmatprep.subr.bf16.mxu0 %v883_v62 }
  0xad   : > { %903 = vmatprep.subr.bf16.mxu1 %v883_v62 }
  0xaf   : > { %886 = vmatpush3.bf16.msra.mxu0 %v885_v1 }
  0xb0   : > { %911 = vmatpush3.bf16.msra.mxu1 %v885_v1  ;;  %888 = vmatprep.subr.bf16.mxu0 %v887_v5 }
  0xb1   : > { %904 = vmatprep.subr.bf16.mxu1 %v887_v5  ;;  %v524_v5 = vld [vmem:[#allocation8] sm:$0xff] }
  0xb3   : > { %890 = vmatpush3.bf16.msra.mxu0 %v889_v10 }
  0xb4   : > { %912 = vmatpush3.bf16.msra.mxu1 %v889_v10  ;;  %892 = vmatprep.subr.bf16.mxu0 %v891_v11 }
  0xb5   : > { %905 = vmatprep.subr.bf16.mxu1 %v891_v11  ;;  %v525_v11 = vld [vmem:[#allocation8 + $0x8] sm:$0xff] }
  0xb7   : > { %894 = vmatpush3.bf16.msra.mxu0 %v893_v14 }
  0xb8   : > { %913 = vmatpush3.bf16.msra.mxu1 %v893_v14  ;;  %896 = vmatprep.subr.bf16.mxu0 %v895_v17 }
  0xb9   : > { %906 = vmatprep.subr.bf16.mxu1 %v895_v17 }
  0xbb   : > { %898 = vmatpush3.bf16.msra.mxu0 %v897_v20 }
  0xbc   : > { %914 = vmatpush3.bf16.msra.mxu1 %v897_v20 }
 0x170   : > { %v396_v21 = vpop.f32.mrb[0].mxu0 }
 0x171   : > { %v484_v22 = vmul.f32 %v396_v21, %v396_v21  ;;  %v398_v23 = vpop.f32.mrb[1].mxu0  ;;  %v473_v39 = vpop.f32.mrb[0].mxu1 }
 0x172   : > { %v485_v24 = vmul.f32 %v398_v23, %v398_v23  ;;  %v475_v42 = vpop.f32.mrb[1].mxu1 }
 0x173   : > { %v488_v25 = vmul.f32 %v484_v22, %v396_v21 }
 0x174   : > { %v489_v26 = vmul.f32 %v485_v24, %v398_v23  ;;  %v402_v27 = vpop.f32.mrb[2].mxu0 }
 0x175   : > { %v492_v28 = vmul.f32 0.044715, %v488_v25  ;;  %v486_v29 = vmul.f32 %v402_v27, %v402_v27  ;;  %v404_v30 = vpop.f32.mrb[3].mxu0  ;;  %v479_v8 = vpop.f32.mrb[2].mxu1 }
 0x176   : > { %v493_v31 = vmul.f32 0.044715, %v489_v26  ;;  %v487_v32 = vmul.f32 %v404_v30, %v404_v30  ;;  %v481_v47 = vpop.f32.mrb[3].mxu1 }
 0x177   : > { %v496_v33 = vadd.f32 %v492_v28, %v396_v21  ;;  %v490_v34 = vmul.f32 %v486_v29, %v402_v27 }
 0x178   : > { %v497_v35 = vadd.f32 %v493_v31, %v398_v23  ;;  %v491_v36 = vmul.f32 %v487_v32, %v404_v30 }
 0x179   : > { %v500_v37 = vmul.f32 0.7978846, %v496_v33  ;;  %v494_v38 = vmul.f32 0.044715, %v490_v34 }
 0x17a   : > { %v501_v40 = vmul.f32 0.7978846, %v497_v35  ;;  %v495_v41 = vmul.f32 0.044715, %v491_v36 }
 0x17b   : > { %1002 = vtanh.f32 %v500_v37  ;;  %v498_v43 = vadd.f32 %v494_v38, %v402_v27 }
 0x17c   : > { %1004 = vtanh.f32 %v501_v40  ;;  %v499_v44 = vadd.f32 %v495_v41, %v404_v30 }
 0x17d   : > { %v502_v45 = vmul.f32 0.7978846, %v498_v43 }
 0x17e   : > { %v503_v46 = vmul.f32 0.7978846, %v499_v44 }
 0x17f   : > { %1006 = vtanh.f32 %v502_v45 }
 0x180   : > { %1008 = vtanh.f32 %v503_v46 }
 0x185   : > { %v1003_v48 = vpop.eup %1002 }
 0x186   : > { %v1005_v49 = vpop.eup %1004  ;;  %v508_v50 = vadd.f32 1.0, %v1003_v48 }
 0x187   : > { %v509_v51 = vadd.f32 1.0, %v1005_v49 }
 0x188   : > { %v512_v52 = vmul.f32 0.5, %v508_v50 }
 0x189   : > { %v1007_v53 = vpop.eup %1006  ;;  %v513_v54 = vmul.f32 0.5, %v509_v51 }
 0x18a   : > { %v1009_v55 = vpop.eup %1008  ;;  %v516_v56 = vmul.f32 %v512_v52, %v396_v21  ;;  %v510_v57 = vadd.f32 1.0, %v1007_v53 }
 0x18b   : > { %v517_v58 = vmul.f32 %v513_v54, %v398_v23  ;;  %v511_v59 = vadd.f32 1.0, %v1009_v55 }
 0x18c   : > { %v520_v60 = vmul.f32 %v516_v56, %v473_v39  ;;  %v514_v61 = vmul.f32 0.5, %v510_v57 }
 0x18d   : > { %v521_v62 = vmul.f32 %v517_v58, %v475_v42  ;;  %v515_v63 = vmul.f32 0.5, %v511_v59 }
 0x18e   : > { %v518_v0 = vmul.f32 %v514_v61, %v402_v27 }
 0x18f   : > { %v519_v1 = vmul.f32 %v515_v63, %v404_v30  ;;  %622 = vmatprep.mubr.f32.mxu0 %v521_v62 }
 0x190   : > { %v522_v2 = vmul.f32 %v518_v0, %v479_v8  ;;  %623 = vmatmul.mubr.f32.vlgmr.msra.gmra.mrb[4].mxu0 %v520_v60 }
 0x191   : > { %v523_v3 = vmul.f32 %v519_v1, %v481_v47 }
 0x193   : > { %627 = vmatprep.mubr.f32.mxu1 %v523_v3 }
 0x194   : > { %628 = vmatmul.mubr.f32.vlgmr.msra.gmra.mrb[4].mxu1 %v522_v2 }
 0x263   : > { %v797_v4 = vpop.f32.mrb[4].mxu0 }
 0x264   : > { %v798_v6 = vpop.f32.mrb[5].mxu0 }
 0x265   : > { %v799_v7 = vadd.f32 %v798_v6, %v797_v4 }
 0x267   : > { %v633_v9 = vadd.f32 %v799_v7, %v524_v5  ;;  %v800_v10 = vpop.f32.mrb[4].mxu1 }
 0x268   : > { %v801_v12 = vpop.f32.mrb[5].mxu1 }
 0x269   : > { %635 = vst [vmem:[#allocation8] sm:$0xff] %v633_v9  ;;  %v802_v13 = vadd.f32 %v801_v12, %v800_v10 }
 0x26b   : > { %v634_v14 = vadd.f32 %v802_v13, %v525_v11 }
 0x26d   : > { %636 = vst [vmem:[#allocation8 + $0x8] sm:$0xff] %v634_v14 }
 0x26e   : > { %1111 = shalt.err (!%p1108_p7)
}
 0x26f   : > { %s1112_s11 = scalar_lea.hbm %s1554_s3, 256 }
 0x270   : > { %p1113_p9 = scmp.ne.s32.totalorder %s1554_s3, %s1112_s11  ;;  %p1118_p12 = scmp.lt.u32.totalorder %s1112_s11, %s1554_s3 }
 0x272   : > { %p1114_p3 = pnand %p1113_p9, %p941_p0 }
 0x274   : > { %p1115_p11 = pneg %p1114_p3 }
 0x276   : > { %p1120_p10 = pnand %p1118_p12, %p1115_p11 }
 0x278   : > { %1123 = shalt.err (!%p1120_p10)
}
 0x279   : > { %s1195_s9 = smov 128   ;;  %s1196_s12 = smov 8  }
 0x27a   : > { %924 = dma.vmem_to_hbm [thread:$0]  (%p941_p0), %s647_s6, 256, %s1554_s3, [#allocation4], %s1195_s9, %s1195_s9, %s1196_s12  }
 0x27b   : > { %1157 = dma.done.wait (%p941_p0), [#allocation4], 256  }
 0x27c   : > { %1159 = vsyncadd (%p941_p0), [#allocation4], 4294967040 }
 0x27d PF: > { %s18_s17 = sadd.s32 1, %s1182_s17   ;;  %s1572_s12 = smov %s1166_s13 }
 0x27e   : > { %p15_p6 = scmp.ge.s32.totalorder %s18_s17, 4   ;;  %s1573_s13 = smov %s1170_s14 }
 0x27f   : > { %s1574_s14 = smov %s1261_s24  ;;  %s1575_s15 = smov %s1178_s16 }
 0x280   : > { %s1576_s16 = smov %s1578_s18  ;;  %17 = sbr.rel (!%p15_p6) target bundleno = 6 (0x6), region = 91 }
 0x287   :  { %662 = vsyncpa [#allocation3], 1 }
 0x288   :  { %664 = vsyncpa [#allocation3 + $0x1], 1 }
 0x289   :  { %665 = vsyncpa [#allocation6], 1 }
 0x28a   :  { %667 = vsyncpa [#allocation6 + $0x1], 1 }
 0x28b   :  { %668 = vsyncpa [#allocation4], 1 }
 0x28c   :  { %670 = vsyncpa [#allocation4 + $0x1], 1 }

</bundles_post_ra>
